<compile_context>
chip_gen: v7x
topology: tpu7x:2x2x1
jax: 0.10.0
libtpu: 0.0.40
codegen_flags: <defaults>
</compile_context>

<pallas_src>
import functools

import jax
import jax.numpy as jnp
import numpy as np
from jax.experimental import pallas as pl
from jax.experimental.pallas import tpu as pltpu

try:  # prefer scipy's Hungarian solver if present (fast host path)
    from scipy.optimize import linear_sum_assignment as _scipy_lsa
except Exception:  # pragma: no cover
    _scipy_lsa = None


_DUMMY_BOX = (0.5, 0.5, 1.0, 1.0)  # benign padding box (positive w, h)


# --------------------------------------------------------------------------
# Pallas kernel: one (Bt x TN x TM) tile of the pairwise L1 + (-GIoU) cost.
# Inputs are precomputed per-box features (cost_bbox folded into cxcywh):
#   pred features  pf: [Bt, TN, 8] = (s*cx, s*cy, s*w, s*h, x0, y0, x1, y1)
#   target features tf: [Bt, 8, TM]  (transposed so targets live on lanes)
# where s = |cost_bbox|.
# --------------------------------------------------------------------------
def _detr_cost_kernel(pf_ref, tf_ref, c_ref, *, w_giou, negate_l1):
    pf = pf_ref[...]          # [Bt, TN, 8]   predictions (sublanes)
    tf = tf_ref[...]          # [Bt, 8, TM]   targets     (lanes)

    # prediction features -> [Bt, TN, 1]
    scx = pf[:, :, 0:1]; scy = pf[:, :, 1:2]
    sw = pf[:, :, 2:3]; sh = pf[:, :, 3:4]
    ox0 = pf[:, :, 4:5]; oy0 = pf[:, :, 5:6]
    ox1 = pf[:, :, 6:7]; oy1 = pf[:, :, 7:8]

    # target features -> [Bt, 1, TM]
    tscx = tf[:, 0:1, :]; tscy = tf[:, 1:2, :]
    tsw = tf[:, 2:3, :]; tsh = tf[:, 3:4, :]
    tx0 = tf[:, 4:5, :]; ty0 = tf[:, 5:6, :]
    tx1 = tf[:, 6:7, :]; ty1 = tf[:, 7:8, :]

    # per-box widths / heights / areas (O(TN)+O(TM) per tile -> negligible)
    ow = ox1 - ox0; oh = oy1 - oy0
    tw = tx1 - tx0; th = ty1 - ty0
    oarea = ow * oh
    tarea = tw * th

    # ---- L1 cost (torch.cdist p=1 on cxcywh coords); cost_bbox is already
    #      folded into the scaled feature columns --------------------------
    cost_l1 = (jnp.abs(scx - tscx) + jnp.abs(scy - tscy)
               + jnp.abs(sw - tsw) + jnp.abs(sh - tsh))        # [Bt, TN, TM]
    if negate_l1:  # only when cost_bbox < 0 (static Python branch)
        cost_l1 = -cost_l1

    # ---- pairwise IoU / enclosing box ------------------------------------
    iw_raw = jnp.minimum(ox1, tx1) - jnp.maximum(ox0, tx0)
    ih_raw = jnp.minimum(oy1, ty1) - jnp.maximum(oy0, ty0)
    inter = jnp.maximum(iw_raw, 0.0) * jnp.maximum(ih_raw, 0.0)
    union = (oarea + tarea) - inter
    # enclosing box via ew = (ow + tw) - iw_raw (valid for well-formed boxes,
    # which the reference asserts: w, h >= 0)
    enclose = ((ow + tw) - iw_raw) * ((oh + th) - ih_raw)

    # divides -> EUP approx reciprocal + one Newton-Raphson refinement
    # (EUP slot stays nearly free; accuracy back to ~f32 so assignments match)
    r_u = pl.reciprocal(union, approx=True)
    r_u = r_u * (2.0 - union * r_u)
    r_e = pl.reciprocal(enclose, approx=True)
    r_e = r_e * (2.0 - enclose * r_e)

    # cost_giou = -giou = -(iou - (enclose - union)/enclose)
    #           = (enclose - union) * r_e - inter * r_u
    neg_giou = (enclose - union) * r_e - inter * r_u
    c_ref[...] = (cost_l1 + w_giou * neg_giou).astype(c_ref.dtype)


# --------------------------------------------------------------------------
# Wrapper: per-batch (block-diagonal) cost matrices via a tiled 3-D grid.
# --------------------------------------------------------------------------
def _round_up(x, m):
    return ((x + m - 1) // m) * m


def _box_features(boxes, l1_scale, feature_axis):
    """[..., 4] cxcywh -> 8 features (s*cx, s*cy, s*w, s*h, x0, y0, x1, y1)."""
    cx = boxes[..., 0]; cy = boxes[..., 1]
    w = boxes[..., 2]; h = boxes[..., 3]
    x0 = cx - 0.5 * w; y0 = cy - 0.5 * h
    x1 = cx + 0.5 * w; y1 = cy + 0.5 * h
    s = float(l1_scale)
    feats = [s * cx, s * cy, s * w, s * h, x0, y0, x1, y1]
    return jnp.stack(feats, axis=feature_axis)


def _choose_tiles(bs, Q, M):
    """Tile sizes + batch folding. Sublane tile multiple of 8, lane tile
    multiple of 128 (lane-dense unmasked stores). Double-buffered output tile
    capped at 8 MiB (fits v5e 16 MiB / v6e 32 MiB / v7x 32 MiB scoped VMEM)."""
    TN = min(512, _round_up(max(Q, 1), 8))
    TM = min(2048, _round_up(max(M, 1), 128))
    Qp = _round_up(Q, TN)
    Mp = _round_up(M, TM)
    steps_qm = (Qp // TN) * (Mp // TM)
    max_tile_bytes = 4 * 1024 * 1024          # per-tile -> 8 MiB double-buffered
    Bt = 1
    for cand in range(1, bs + 1):
        if bs % cand:
            continue
        if cand * TN * TM * 4 > max_tile_bytes:
            continue
        # keep >= 2 grid steps when possible (v7x has 2 TensorCores)
        if steps_qm == 1 and bs > 1 and (bs // cand) < 2:
            continue
        Bt = cand
    return TN, TM, Qp, Mp, Bt


@functools.partial(jax.jit, static_argnames=("cost_bbox", "cost_giou"))
def detr_cost_matrices(pred_boxes, tgt_boxes, *, cost_bbox=1.0, cost_giou=1.0):
    """pred_boxes: [bs, Q, 4] cxcywh; tgt_boxes: [bs, M, 4] cxcywh (per-batch
    padded with benign dummy boxes).  Returns C: [bs, Qp, Mp] float32; the
    caller slices the valid [Q, sizes[b]] region per batch element."""
    bs, Q, _ = pred_boxes.shape
    _, M, _ = tgt_boxes.shape
    TN, TM, Qp, Mp, Bt = _choose_tiles(bs, Q, M)

    dummy = jnp.asarray(_DUMMY_BOX, jnp.float32)
    pb = jnp.asarray(pred_boxes, jnp.float32)
    tb = jnp.asarray(tgt_boxes, jnp.float32)
    if Qp > Q:
        pb = jnp.concatenate([pb, jnp.broadcast_to(dummy, (bs, Qp - Q, 4))], axis=1)
    if Mp > M:
        tb = jnp.concatenate([tb, jnp.broadcast_to(dummy, (bs, Mp - M, 4))], axis=1)

    # Per-box conversion hoisted out of the O(N*M) tile body; |cost_bbox|
    # folded into the cxcywh columns.
    l1_scale = abs(float(cost_bbox))
    pred_feats = _box_features(pb, l1_scale, feature_axis=-1)    # [bs, Qp, 8]
    tgt_feats = _box_features(tb, l1_scale, feature_axis=1)      # [bs, 8, Mp]

    kernel = functools.partial(
        _detr_cost_kernel,
        w_giou=float(cost_giou),
        negate_l1=(float(cost_bbox) < 0.0),
    )

    grid = (bs // Bt, Qp // TN, Mp // TM)   # target axis innermost: pred tile
    return pl.pallas_call(                  # is j-invariant -> no re-DMA
        kernel,
        out_shape=jax.ShapeDtypeStruct((bs, Qp, Mp), jnp.float32),
        grid=grid,
        in_specs=[
            pl.BlockSpec((Bt, TN, 8), lambda b, i, j: (b, i, 0)),
            pl.BlockSpec((Bt, 8, TM), lambda b, i, j: (b, 0, j)),
        ],
        out_specs=pl.BlockSpec((Bt, TN, TM), lambda b, i, j: (b, i, j)),
        compiler_params=pltpu.CompilerParams(
            dimension_semantics=("parallel", "parallel", "parallel")),
    )(pred_feats, tgt_feats)


# --------------------------------------------------------------------------
# Host-side Hungarian assignment.
# TODO(synk): linear_sum_assignment is a sequential, data-dependent algorithm
# with no clean Pallas equivalent; it stays on host (scipy if available, else
# a numpy Jonker-Volgenant implementation).
# --------------------------------------------------------------------------
def _lsa_numpy(cost):
    cost = np.asarray(cost, dtype=np.float64)
    if cost.ndim != 2 or cost.shape[0] == 0 or cost.shape[1] == 0:
        return np.empty(0, np.int64), np.empty(0, np.int64)
    transposed = False
    if cost.shape[0] > cost.shape[1]:
        cost = cost.T
        transposed = True
    n, m = cost.shape                       # n <= m
    u = np.zeros(n + 1)
    v = np.zeros(m + 1)
    p = np.zeros(m + 1, dtype=np.int64)
    way = np.zeros(m + 1, dtype=np.int64)
    for i in range(1, n + 1):
        p[0] = i
        j0 = 0
        minv = np.full(m + 1, np.inf)
        used = np.zeros(m + 1, dtype=bool)
        while True:
            used[j0] = True
            i0 = p[j0]
            jfree = np.nonzero(~used[1:])[0] + 1
            cur = cost[i0 - 1, jfree - 1] - u[i0] - v[jfree]
            better = cur < minv[jfree]
            upd = jfree[better]
            minv[upd] = cur[better]
            way[upd] = j0
            k = int(np.argmin(minv[jfree]))
            j1 = int(jfree[k])
            delta = minv[j1]
            used_idx = np.nonzero(used)[0]
            u[p[used_idx]] += delta
            v[used_idx] -= delta
            minv[jfree] -= delta
            j0 = j1
            if p[j0] == 0:
                break
        while True:
            j1 = int(way[j0])
            p[j0] = p[j1]
            j0 = j1
            if j0 == 0:
                break
    rows, cols = [], []
    for j in range(1, m + 1):
        if p[j] != 0:
            rows.append(p[j] - 1)
            cols.append(j - 1)
    rows = np.asarray(rows, dtype=np.int64)
    cols = np.asarray(cols, dtype=np.int64)
    if transposed:
        rows, cols = cols, rows
    order = np.argsort(rows)
    return rows[order], cols[order]


def linear_sum_assignment(cost):
    cost = np.asarray(cost, dtype=np.float64)
    if cost.shape[0] == 0 or cost.shape[1] == 0:
        return np.empty(0, np.int64), np.empty(0, np.int64)
    if _scipy_lsa is not None:
        r, c = _scipy_lsa(cost)
        return np.asarray(r, np.int64), np.asarray(c, np.int64)
    return _lsa_numpy(cost)


# --------------------------------------------------------------------------
# Matcher module
# --------------------------------------------------------------------------
def _pad_targets(targets, m_pad):
    """Stack per-image target boxes into [bs, m_pad, 4] with dummy padding."""
    out = np.broadcast_to(np.asarray(_DUMMY_BOX, np.float32),
                          (len(targets), m_pad, 4)).copy()
    for b, t in enumerate(targets):
        boxes = np.asarray(t["boxes"], np.float32).reshape(-1, 4)
        out[b, :boxes.shape[0]] = boxes
    return jnp.asarray(out)


class HungarianMatcherDETR:
    def __init__(self, cost_class=1.0, cost_bbox=1.0, cost_giou=1.0):
        assert cost_class != 0 or cost_bbox != 0 or cost_giou != 0, "all costs cant be 0"
        # NOTE: like the reference forward, cost_class is never added to C.
        self.cost_class = cost_class
        self.cost_bbox = cost_bbox
        self.cost_giou = cost_giou

    def __call__(self, outputs, targets):
        bs, num_queries = outputs["pred_logits"].shape[:2]
        pred_boxes = jnp.asarray(outputs["pred_boxes"], jnp.float32)  # [bs, Q, 4]
        sizes = [int(np.asarray(t["boxes"]).reshape(-1, 4).shape[0]) for t in targets]
        m_max = max(sizes) if sizes else 0

        if m_max == 0:
            return [(np.empty(0, np.int64), np.empty(0, np.int64)) for _ in range(bs)]

        # Bucket padded target count (multiple of 128 lanes) -> stable jit shapes.
        m_pad = _round_up(m_max, 128)
        tgt_padded = _pad_targets(targets, m_pad)                     # [bs, m_pad, 4]

        # Only block-diagonal per-image costs are computed (no cross-batch waste).
        C = detr_cost_matrices(pred_boxes, tgt_padded,
                               cost_bbox=float(self.cost_bbox),
                               cost_giou=float(self.cost_giou))
        C_np = np.asarray(jax.block_until_ready(C))                   # [bs, Qp, Mp]

        indices = []
        for b in range(bs):
            c_b = C_np[b, :num_queries, :sizes[b]]
            i_idx, j_idx = linear_sum_assignment(c_b)
            indices.append((np.asarray(i_idx, np.int64), np.asarray(j_idx, np.int64)))
        return indices


# --------------------------------------------------------------------------
# Demo / sanity check
# --------------------------------------------------------------------------
def _ref_cost_np(out_bbox, tgt_bbox, w_bbox, w_giou):
    out = np.asarray(out_bbox, np.float64)
    tgt = np.asarray(tgt_bbox, np.float64)
    cost_bbox = np.abs(out[:, None, :] - tgt[None, :, :]).sum(-1)

    def xyxy(b):
        cx, cy, w, h = b[:, 0], b[:, 1], b[:, 2], b[:, 3]
        return np.stack([cx - 0.5 * w, cy - 0.5 * h, cx + 0.5 * w, cy + 0.5 * h], -1)

    b1, b2 = xyxy(out), xyxy(tgt)
    area1 = (b1[:, 2] - b1[:, 0]) * (b1[:, 3] - b1[:, 1])
    area2 = (b2[:, 2] - b2[:, 0]) * (b2[:, 3] - b2[:, 1])
    lt = np.maximum(b1[:, None, :2], b2[None, :, :2])
    rb = np.minimum(b1[:, None, 2:], b2[None, :, 2:])
    wh = np.clip(rb - lt, 0, None)
    inter = wh[..., 0] * wh[..., 1]
    union = area1[:, None] + area2[None, :] - inter
    iou = inter / union
    elt = np.minimum(b1[:, None, :2], b2[None, :, :2])
    erb = np.maximum(b1[:, None, 2:], b2[None, :, 2:])
    ewh = np.clip(erb - elt, 0, None)
    enclose = ewh[..., 0] * ewh[..., 1]
    giou = iou - (enclose - union) / enclose
    return w_bbox * cost_bbox + w_giou * (-giou)


def _rand_boxes(key, leading_shape):
    k1, k2 = jax.random.split(key)
    cxcy = jax.random.uniform(k1, leading_shape + (2,), minval=0.2, maxval=0.8)
    wh = jax.random.uniform(k2, leading_shape + (2,), minval=0.05, maxval=0.3)
    return jnp.concatenate([cxcy, wh], axis=-1).astype(jnp.float32)


if __name__ == "__main__":
    key = jax.random.PRNGKey(0)
    bs, num_queries, num_classes = 2, 8, 5
    k1, k2, k3, k4 = jax.random.split(key, 4)

    pred_logits = jax.random.normal(k1, (bs, num_queries, num_classes), jnp.float32)
    pred_boxes = _rand_boxes(k2, (bs, num_queries))

    sizes = [3, 2]
    targets = []
    tkeys = jax.random.split(k3, len(sizes))
    for i, s in enumerate(sizes):
        boxes = _rand_boxes(tkeys[i], (s,))
        labels = jax.random.randint(k4, (s,), 0, num_classes)
        targets.append({"boxes": boxes, "labels": labels})

    # --- kernel correctness vs numpy reference (config 1: small DETR-ish) ---
    m_pad = _round_up(max(sizes), 128)
    tgt_padded = _pad_targets(targets, m_pad)
    C = detr_cost_matrices(pred_boxes, tgt_padded, cost_bbox=1.0, cost_giou=1.0)
    C_np = np.asarray(jax.block_until_ready(C))
    for b in range(bs):
        ref = _ref_cost_np(np.asarray(pred_boxes[b]),
                           np.asarray(targets[b]["boxes"]), 1.0, 1.0)
        got = C_np[b, :num_queries, :sizes[b]]
        assert np.allclose(got, ref, rtol=1e-4, atol=1e-4), \
            f"cost mismatch batch {b}: max|diff|={np.abs(got - ref).max()}"

    # --- config 2: exercises batch folding (Bt=2) and non-unit weights ------
    bs2, q2 = 4, 64
    sizes2 = [5, 9, 1, 7]
    k5, k6 = jax.random.split(k4)
    pred_boxes2 = _rand_boxes(k5, (bs2, q2))
    tgt_boxes2 = [_rand_boxes(k, (s,)) for k, s in
                  zip(jax.random.split(k6, bs2), sizes2)]
    tgt_padded2 = _pad_targets([{"boxes": b} for b in tgt_boxes2],
                               _round_up(max(sizes2), 128))
    C2 = detr_cost_matrices(pred_boxes2, tgt_padded2, cost_bbox=2.0, cost_giou=3.0)
    C2_np = np.asarray(jax.block_until_ready(C2))
    for b in range(bs2):
        ref = _ref_cost_np(np.asarray(pred_boxes2[b]),
                           np.asarray(tgt_boxes2[b]), 2.0, 3.0)
        got = C2_np[b, :q2, :sizes2[b]]
        assert np.allclose(got, ref, rtol=1e-4, atol=1e-4), \
            f"cost mismatch (cfg2) batch {b}: max|diff|={np.abs(got - ref).max()}"

    # --- end-to-end matcher --------------------------------------------------
    matcher = HungarianMatcherDETR(cost_class=1.0, cost_bbox=1.0, cost_giou=1.0)
    outputs = {"pred_logits": pred_logits, "pred_boxes": pred_boxes}
    indices = matcher(outputs, targets)

    assert len(indices) == bs
    for (i_idx, j_idx), s in zip(indices, sizes):
        assert len(i_idx) == len(j_idx) == min(num_queries, s)
        assert np.all(i_idx >= 0) and np.all(i_idx < num_queries)
        assert np.all(j_idx >= 0) and np.all(j_idx < s)

    print("KERNEL_OK")
</pallas_src>

<mosaic_0001>
module attributes {stable_mosaic.version = 11 : i64} {
  func.func @_detr_cost_kernel(%arg0: i32, %arg1: i32, %arg2: i32, %arg3: memref<1x8x8xf32, #tpu.memory_space<vmem>>, %arg4: memref<1x8x128xf32, #tpu.memory_space<vmem>>, %arg5: memref<1x8x128xf32, #tpu.memory_space<vmem>>) attributes {dimension_semantics = [#tpu.dimension_semantics<parallel>, #tpu.dimension_semantics<parallel>, #tpu.dimension_semantics<parallel>], iteration_bounds = array<i64: 2, 1, 1>, scalar_prefetch = 0 : i64, scratch_operands = 0 : i64, tpu.core_type = #tpu.core_type<tc>, window_params = [{transform_indices = @transform_0, window_bounds = array<i64: 1, 8, 8>}, {transform_indices = @transform_1, window_bounds = array<i64: 1, 8, 128>}, {transform_indices = @transform_2, window_bounds = array<i64: 1, 8, 128>}]} {
    %c0 = arith.constant 0 : index
    %c0_0 = arith.constant 0 : index
    %c0_1 = arith.constant 0 : index
    %0 = vector.load %arg3[%c0, %c0_0, %c0_1] : memref<1x8x8xf32, #tpu.memory_space<vmem>>, vector<1x8x8xf32>
    %c0_2 = arith.constant 0 : index
    %c0_3 = arith.constant 0 : index
    %c0_4 = arith.constant 0 : index
    %1 = vector.load %arg4[%c0_2, %c0_3, %c0_4] : memref<1x8x128xf32, #tpu.memory_space<vmem>>, vector<1x8x128xf32>
    %2 = vector.extract_strided_slice %0 {offsets = [0, 0, 0], sizes = [1, 8, 1], strides = [1, 1, 1]} : vector<1x8x8xf32> to vector<1x8x1xf32>
    %3 = vector.extract_strided_slice %0 {offsets = [0, 0, 1], sizes = [1, 8, 1], strides = [1, 1, 1]} : vector<1x8x8xf32> to vector<1x8x1xf32>
    %4 = vector.extract_strided_slice %0 {offsets = [0, 0, 2], sizes = [1, 8, 1], strides = [1, 1, 1]} : vector<1x8x8xf32> to vector<1x8x1xf32>
    %5 = vector.extract_strided_slice %0 {offsets = [0, 0, 3], sizes = [1, 8, 1], strides = [1, 1, 1]} : vector<1x8x8xf32> to vector<1x8x1xf32>
    %6 = vector.extract_strided_slice %0 {offsets = [0, 0, 4], sizes = [1, 8, 1], strides = [1, 1, 1]} : vector<1x8x8xf32> to vector<1x8x1xf32>
    %7 = vector.extract_strided_slice %0 {offsets = [0, 0, 5], sizes = [1, 8, 1], strides = [1, 1, 1]} : vector<1x8x8xf32> to vector<1x8x1xf32>
    %8 = vector.extract_strided_slice %0 {offsets = [0, 0, 6], sizes = [1, 8, 1], strides = [1, 1, 1]} : vector<1x8x8xf32> to vector<1x8x1xf32>
    %9 = vector.extract_strided_slice %0 {offsets = [0, 0, 7], sizes = [1, 8, 1], strides = [1, 1, 1]} : vector<1x8x8xf32> to vector<1x8x1xf32>
    %10 = vector.extract_strided_slice %1 {offsets = [0, 0, 0], sizes = [1, 1, 128], strides = [1, 1, 1]} : vector<1x8x128xf32> to vector<1x1x128xf32>
    %11 = vector.extract_strided_slice %1 {offsets = [0, 1, 0], sizes = [1, 1, 128], strides = [1, 1, 1]} : vector<1x8x128xf32> to vector<1x1x128xf32>
    %12 = vector.extract_strided_slice %1 {offsets = [0, 2, 0], sizes = [1, 1, 128], strides = [1, 1, 1]} : vector<1x8x128xf32> to vector<1x1x128xf32>
    %13 = vector.extract_strided_slice %1 {offsets = [0, 3, 0], sizes = [1, 1, 128], strides = [1, 1, 1]} : vector<1x8x128xf32> to vector<1x1x128xf32>
    %14 = vector.extract_strided_slice %1 {offsets = [0, 4, 0], sizes = [1, 1, 128], strides = [1, 1, 1]} : vector<1x8x128xf32> to vector<1x1x128xf32>
    %15 = vector.extract_strided_slice %1 {offsets = [0, 5, 0], sizes = [1, 1, 128], strides = [1, 1, 1]} : vector<1x8x128xf32> to vector<1x1x128xf32>
    %16 = vector.extract_strided_slice %1 {offsets = [0, 6, 0], sizes = [1, 1, 128], strides = [1, 1, 1]} : vector<1x8x128xf32> to vector<1x1x128xf32>
    %17 = vector.extract_strided_slice %1 {offsets = [0, 7, 0], sizes = [1, 1, 128], strides = [1, 1, 1]} : vector<1x8x128xf32> to vector<1x1x128xf32>
    %18 = arith.subf %8, %6 : vector<1x8x1xf32>
    %19 = arith.subf %9, %7 : vector<1x8x1xf32>
    %20 = arith.subf %16, %14 : vector<1x1x128xf32>
    %21 = arith.subf %17, %15 : vector<1x1x128xf32>
    %22 = arith.mulf %18, %19 : vector<1x8x1xf32>
    %23 = arith.mulf %20, %21 : vector<1x1x128xf32>
    %24 = vector.broadcast %2 : vector<1x8x1xf32> to vector<1x8x128xf32>
    %25 = vector.broadcast %10 : vector<1x1x128xf32> to vector<1x8x128xf32>
    %26 = arith.subf %24, %25 : vector<1x8x128xf32>
    %27 = math.absf %26 : vector<1x8x128xf32>
    %28 = vector.broadcast %3 : vector<1x8x1xf32> to vector<1x8x128xf32>
    %29 = vector.broadcast %11 : vector<1x1x128xf32> to vector<1x8x128xf32>
    %30 = arith.subf %28, %29 : vector<1x8x128xf32>
    %31 = math.absf %30 : vector<1x8x128xf32>
    %32 = arith.addf %27, %31 : vector<1x8x128xf32>
    %33 = vector.broadcast %4 : vector<1x8x1xf32> to vector<1x8x128xf32>
    %34 = vector.broadcast %12 : vector<1x1x128xf32> to vector<1x8x128xf32>
    %35 = arith.subf %33, %34 : vector<1x8x128xf32>
    %36 = math.absf %35 : vector<1x8x128xf32>
    %37 = arith.addf %32, %36 : vector<1x8x128xf32>
    %38 = vector.broadcast %5 : vector<1x8x1xf32> to vector<1x8x128xf32>
    %39 = vector.broadcast %13 : vector<1x1x128xf32> to vector<1x8x128xf32>
    %40 = arith.subf %38, %39 : vector<1x8x128xf32>
    %41 = math.absf %40 : vector<1x8x128xf32>
    %42 = arith.addf %37, %41 : vector<1x8x128xf32>
    %43 = vector.broadcast %8 : vector<1x8x1xf32> to vector<1x8x128xf32>
    %44 = vector.broadcast %16 : vector<1x1x128xf32> to vector<1x8x128xf32>
    %45 = arith.minimumf %43, %44 : vector<1x8x128xf32>
    %46 = vector.broadcast %6 : vector<1x8x1xf32> to vector<1x8x128xf32>
    %47 = vector.broadcast %14 : vector<1x1x128xf32> to vector<1x8x128xf32>
    %48 = arith.maximumf %46, %47 : vector<1x8x128xf32>
    %49 = arith.subf %45, %48 : vector<1x8x128xf32>
    %50 = vector.broadcast %9 : vector<1x8x1xf32> to vector<1x8x128xf32>
    %51 = vector.broadcast %17 : vector<1x1x128xf32> to vector<1x8x128xf32>
    %52 = arith.minimumf %50, %51 : vector<1x8x128xf32>
    %53 = vector.broadcast %7 : vector<1x8x1xf32> to vector<1x8x128xf32>
    %54 = vector.broadcast %15 : vector<1x1x128xf32> to vector<1x8x128xf32>
    %55 = arith.maximumf %53, %54 : vector<1x8x128xf32>
    %56 = arith.subf %52, %55 : vector<1x8x128xf32>
    %cst = arith.constant 0.000000e+00 : f32
    %57 = vector.broadcast %cst : f32 to vector<1x8x128xf32>
    %58 = arith.maximumf %49, %57 : vector<1x8x128xf32>
    %cst_5 = arith.constant 0.000000e+00 : f32
    %59 = vector.broadcast %cst_5 : f32 to vector<1x8x128xf32>
    %60 = arith.maximumf %56, %59 : vector<1x8x128xf32>
    %61 = arith.mulf %58, %60 : vector<1x8x128xf32>
    %62 = vector.broadcast %22 : vector<1x8x1xf32> to vector<1x8x128xf32>
    %63 = vector.broadcast %23 : vector<1x1x128xf32> to vector<1x8x128xf32>
    %64 = arith.addf %62, %63 : vector<1x8x128xf32>
    %65 = arith.subf %64, %61 : vector<1x8x128xf32>
    %66 = vector.broadcast %18 : vector<1x8x1xf32> to vector<1x8x128xf32>
    %67 = vector.broadcast %20 : vector<1x1x128xf32> to vector<1x8x128xf32>
    %68 = arith.addf %66, %67 : vector<1x8x128xf32>
    %69 = arith.subf %68, %49 : vector<1x8x128xf32>
    %70 = vector.broadcast %19 : vector<1x8x1xf32> to vector<1x8x128xf32>
    %71 = vector.broadcast %21 : vector<1x1x128xf32> to vector<1x8x128xf32>
    %72 = arith.addf %70, %71 : vector<1x8x128xf32>
    %73 = arith.subf %72, %56 : vector<1x8x128xf32>
    %74 = arith.mulf %69, %73 : vector<1x8x128xf32>
    %75 = tpu.reciprocal %65 {approx = true} : vector<1x8x128xf32> -> vector<1x8x128xf32>
    %76 = arith.mulf %65, %75 : vector<1x8x128xf32>
    %cst_6 = arith.constant 2.000000e+00 : f32
    %77 = vector.broadcast %cst_6 : f32 to vector<1x8x128xf32>
    %78 = arith.subf %77, %76 : vector<1x8x128xf32>
    %79 = arith.mulf %75, %78 : vector<1x8x128xf32>
    %80 = tpu.reciprocal %74 {approx = true} : vector<1x8x128xf32> -> vector<1x8x128xf32>
    %81 = arith.mulf %74, %80 : vector<1x8x128xf32>
    %cst_7 = arith.constant 2.000000e+00 : f32
    %82 = vector.broadcast %cst_7 : f32 to vector<1x8x128xf32>
    %83 = arith.subf %82, %81 : vector<1x8x128xf32>
    %84 = arith.mulf %80, %83 : vector<1x8x128xf32>
    %85 = arith.subf %74, %65 : vector<1x8x128xf32>
    %86 = arith.mulf %85, %84 : vector<1x8x128xf32>
    %87 = arith.mulf %61, %79 : vector<1x8x128xf32>
    %88 = arith.subf %86, %87 : vector<1x8x128xf32>
    %cst_8 = arith.constant 1.000000e+00 : f32
    %89 = vector.broadcast %cst_8 : f32 to vector<1x8x128xf32>
    %90 = arith.mulf %89, %88 : vector<1x8x128xf32>
    %91 = arith.addf %42, %90 : vector<1x8x128xf32>
    %c0_9 = arith.constant 0 : index
    %c0_10 = arith.constant 0 : index
    %c0_11 = arith.constant 0 : index
    %92 = vector.load %arg5[%c0_9, %c0_10, %c0_11] : memref<1x8x128xf32, #tpu.memory_space<vmem>>, vector<1x8x128xf32>
    tpu.vector_store %arg5[%c0_9, %c0_10, %c0_11], %91 {strides = array<i32>} : memref<1x8x128xf32, #tpu.memory_space<vmem>>, vector<1x8x128xf32>,
    return
  }
  func.func @transform_0(%arg0: i32, %arg1: i32, %arg2: i32) -> (i32, i32, i32) {
    %c0_i32 = arith.constant 0 : i32
    %c0_i32_0 = arith.constant 0 : i32
    return %arg0, %arg1, %c0_i32 : i32, i32, i32
  }
  func.func @transform_1(%arg0: i32, %arg1: i32, %arg2: i32) -> (i32, i32, i32) {
    %c0_i32 = arith.constant 0 : i32
    %c0_i32_0 = arith.constant 0 : i32
    return %arg0, %c0_i32, %arg2 : i32, i32, i32
  }
  func.func @transform_2(%arg0: i32, %arg1: i32, %arg2: i32) -> (i32, i32, i32) {
    %c0_i32 = arith.constant 0 : i32
    return %arg0, %arg1, %arg2 : i32, i32, i32
  }
}

</mosaic_0001>

<bundles_post_ra>
// kernel: detr_cost_matrices.1
= control target key start
LH: loop header
LB: loop body
LE: loop exit
PB: predicated region body
PF: predicated region fallthrough
CT: control target
= control target key end

     0   :  { %7 = vsyncpa [#allocation3], 0  ;;  %s776_s0 = inlined_call_operand.vmem [shape: f32[2,8,8], index: 0, kind: input, shape index: {}]   ;;  %s777_s1 = inlined_call_operand.vmem [shape: f32[2,8,128], index: 1, kind: input, shape index: {}]   ;;  %s778_s2 = inlined_call_operand.hbm [shape: f32[2,8,128], index: 2, kind: output, shape index: {}]  }
   0x1   :  { %9 = vsyncpa [#allocation3 + $0x1], 0  ;;  %s654_s9 = smov 0   ;;  %s656_s10 = smov 0  }
   0x2   :  { %s658_s11 = smov 0   ;;  %s660_s12 = smov 0  }
   0x3   :  { %s662_s13 = smov 0   ;;  %s664_s14 = smov 0  }
   0x4 LB: > { %s457_s15 = sadd.s32 4294967295, %s626_s14   ;;  %s458_s16 = sadd.s32 4294967294, %s626_s14   ;;  %s626_s14 = sphi %s664_s14, %s15_s14   ;;  %s622_s13 = sphi %s662_s13, %s785_s13   ;;  %s618_s12 = sphi %s660_s12, %s784_s12   ;;  %s614_s11 = sphi %s658_s11, %s783_s11   ;;  %s610_s10 = sphi %s656_s10, %s782_s10   ;;  %s606_s9 = sphi %s654_s9, %s781_s9  }
   0x5   : > { %s34_s17 = sadd.s32 1, %s622_s13  ;;  %s101_s18 = sadd.s32 1, %s614_s11 }
   0x6   : > { %p36_p0 = scmp.ge.s32.totalorder %s34_s17, 2  ;;  %p111_p1 = scmp.ne.s32.totalorder %s614_s11, %s610_s10 }
   0x7   : > { %p112_p2 = scmp.eq.s32.totalorder %s457_s15, 1  ;;  %p117_p3 = scmp.ne.s32.totalorder %s610_s10, %s606_s9 }
   0x8   : > { %s787_s17 = smov (%p36_p0, %s34_s17), 0  ;;  %p118_p5 = scmp.eq.s32.totalorder %s458_s16, 1 }
   0x9   : > { %p694_p4 = por %p112_p2, %p111_p1  ;;  %s94_s20 = ssub.s32 %s622_s13, %s787_s17 }
   0xa   : > { %p461_p6 = scmp.ge.s32.totalorder %s626_s14, 1  ;;  %p99_p7 = scmp.eq.s32.totalorder %s94_s20, 0 }
   0xb   : > { %p701_p8 = por %p118_p5, %p117_p3  ;;  %p156_p9 = scmp.lt.s32.totalorder %s626_s14, 3 }
   0xc   : > { %s707_s22 = scalar_select %p99_p7, %s614_s11, %s101_s18  }
   0xd   : > { %p157_p10 = pnand %p461_p6, %p156_p9 }
   0xe   : > { %p187_p11 = scmp.lt.s32.totalorder (!%p157_p10), %s618_s12, 1  ;;  %v628_v0 = vmov (!%p157_p10), 6   ;;  %v629_v1 = vmov (!%p157_p10), 7   ;;  %s630_s28 = smov (!%p157_p10), 2   ;;  %v631_v3 = vmov (!%p157_p10), 4   ;;  %v632_v4 = vmov (!%p157_p10), 5  }
   0xf   : > { %160 = sbr.rel (%p157_p10) target bundleno = 430 (0x1ae), region = 28  ;;  %534 = vset.pattern.permute.xlu1 (!%p157_p10), %v628_v0  ;;  %536 = vset.pattern.permute.xlu0 (!%p157_p10), %v629_v1  ;;  %s633_s29 = smov (!%p157_p10), 127   ;;  %v634_v7 = vmov (!%p157_p10), 0   ;;  %v635_v8 = vmov (!%p157_p10), 3   ;;  %v636_v11 = vmov (!%p157_p10), 1   ;;  %v637_v12 = vmov (!%p157_p10), 2  }
  0x10   : > { %v225_v14 = vlaneseq (!%p157_p10)  ;;  %s184_s5 = sand.u32 (!%p157_p10), 1, %s610_s10   ;;  %s466_s7 = sshll.u32 (!%p157_p10), %s618_s12, 7 }
  0x11   : > { %s462_s6 = sshll.u32 (!%p157_p10), %s184_s5, 3  ;;  %s729_s20 = scalar_lea.hbm (!%p157_p10), %s778_s2, %s466_s7 }
  0x12   : > { %v226_v15 = vshrl.u32 (!%p157_p10), %v225_v14, 7  ;;  %s186_s8 = scalar_lea.vmem (!%p157_p10), [#allocation2], %s462_s6 }
  0x13   : > { %s367_s15 = sshll.u32 (!%p157_p10), %s186_s8, 4  ;;  %s731_s15 = int_to_ptr.vmem [resolvable:$true] %s367_s15 }
  0x14   : > { %v298_v18 = vsub.s32 (!%p157_p10), 5, %v226_v15  ;;  %v289_v19 = vsub.s32 (!%p157_p10), 7, %v226_v15  ;;  %v270_v20 = vsub.s32 (!%p157_p10), 6, %v226_v15  ;;  %v279_v21 = vsub.s32 (!%p157_p10), 4, %v226_v15 }
  0x15   : > { %v237_v51 = vsub.s32 (!%p157_p10), 1, %v226_v15  ;;  %v227_v52 = vsub.s32 (!%p157_p10), 0, %v226_v15  ;;  %v248_v58 = vsub.s32 (!%p157_p10), 2, %v226_v15  ;;  %v259_v61 = vsub.s32 (!%p157_p10), 3, %v226_v15 }
  0x16   : > { %s711_s23 = scalar_select %p187_p11, %s618_s12, 1 }
  0x17   : > { %s638_s12 = smov [#allocation2]  }
  0x18   : > { %s463_s24 = sshll.u32 %s711_s23, 3  ;;  %s352_s23 = scalar_lea.sflag [#allocation3], %s184_s5 }
  0x19   : > { %s193_s27 = scalar_lea.vmem %s776_s0, %s463_s24  ;;  %s200_s4 = scalar_lea.vmem %s777_s1, %s463_s24 }
  0x1a   : > { %v201_v2 = vld [vmem:[%s193_s27] sm:$0xff]  ;;  %s548_s24 = scalar_lea.vmem %s731_s15, 128  ;;  %s552_s25 = sshll.u32 %s638_s12, 4  ;;  %s553_s25 = int_to_ptr.vmem [resolvable:$false] %s552_s25 }
  0x1b   : > { %204 = vrot.lane.b32.xlu0 %v201_v2, %s630_s28  ;;  %265 = vperm.xlu1 %534, %v201_v2   ;;  %v202_v16 = vld [vmem:[%s200_s4] sm:$0xff]  ;;  %p549_p12 = scmp.ne.s32.totalorder %s731_s15, %s548_s24  ;;  %s554_s26 = scalar_lea.vmem %s553_s25, 256 }
  0x1c   : > { %v209_v22 = vrot.slane %v202_v16, 6  ;;  %v299_v24 = vrot.slane %v202_v16, %v298_v18  ;;  %v290_v25 = vrot.slane %v202_v16, %v289_v19  ;;  %v271_v27 = vrot.slane %v202_v16, %v270_v20  ;;  %p555_p1 = scmp.lt.s32.totalorder %s731_s15, %s553_s25  ;;  %p556_p2 = scmp.lt.s32.totalorder %s554_s26, %s548_s24 }
  0x1d   : > { %v280_v28 = vrot.slane %v202_v16, %v279_v21  ;;  %v238_v56 = vrot.slane %v202_v16, %v237_v51  ;;  %v228_v57 = vrot.slane %v202_v16, %v227_v52  ;;  %p550_p13 = pnand %p549_p12, %p694_p4 }
  0x1e   : > { %v211_v29 = vsub.f32 %v202_v16, %v209_v22  ;;  %p557_p3 = por %p556_p2, %p555_p1 }
  0x1f   : > { %535 = vset.pattern.permute.xlu1 %v631_v3  ;;  %v260_v3 = vrot.slane %v202_v16, %v259_v61  ;;  %p551_p0 = pneg %p550_p13 }
  0x20   : > { %274 = vperm.xlu1 %535, %v201_v2   ;;  %v333_v32 = vrot.slane %v211_v29, %v289_v19  ;;  %v323_v36 = vrot.slane %v211_v29, %v270_v20  ;;  %v218_v42 = vrot.slane %v211_v29, 1 }
  0x21   : > { %p558_p5 = pnand %p557_p3, %p551_p0 }
  0x22   : > { %v220_v45 = vmul.f32 %v218_v42, %v211_v29 }
  0x24   : > { %537 = vset.pattern.permute.xlu1 %v632_v4  ;;  %v313_v49 = vrot.slane %v220_v45, %v270_v20 }
  0x25   : > { %293 = vperm.xlu1 %537, %v201_v2  }
  0x29   : > { %538 = vset.pattern.permute.xlu1 %v628_v0  ;;  %v249_v0 = vrot.slane %v202_v16, %v248_v58 }
  0x8d   : > { %v205_v5 = vpop.permute.xlu0 %204 }
  0x8e   : > { %v207_v6 = vsub.f32 %v201_v2, %v205_v5 }
  0x90   : > { %317 = vperm.xlu1 %538, %v207_v6   ;;  %213 = vrot.lane.b32.xlu0 %v207_v6, %s633_s29 }
  0x94   : > { %284 = vperm.xlu0 %536, %v201_v2  }
  0x98   : > { %327 = vperm.xlu0 %536, %v207_v6  }
  0x9a   : > { %v266_v13 = vpop.permute.xlu1 %265 }
  0x9b   : > { %v272_v34 = vmin.f32 %v266_v13, %v271_v27 }
  0x9c   : > { %539 = vset.pattern.permute.xlu0 %v634_v7 }
  0x9d   : > { %222 = vperm.xlu0 %539, %v201_v2  }
  0x9f   : > { %v275_v17 = vpop.permute.xlu1 %274 }
  0xa0   : > { %v281_v35 = vmax.f32 %v275_v17, %v280_v28 }
  0xa1   : > { %542 = vset.pattern.permute.xlu0 %v635_v8 }
  0xa2   : > { %254 = vperm.xlu0 %542, %v201_v2   ;;  %v282_v40 = vsub.f32 %v272_v34, %v281_v35 }
  0xa4   : > { %v294_v26 = vpop.permute.xlu1 %293  ;;  %v302_v47 = vmax.f32 %v282_v40, 0.0 }
  0xa5   : > { %v300_v30 = vmax.f32 %v294_v26, %v299_v24 }
  0xa6   : > { %543 = vset.pattern.permute.xlu0 %v629_v1 }
 0x102   : > { %v214_v9 = vpop.permute.xlu0 %213 }
 0x103   : > { %v216_v10 = vmul.f32 %v214_v9, %v207_v6 }
 0x105   : > { %307 = vperm.xlu1 %538, %v216_v10  }
 0x109   : > { %540 = vset.pattern.permute.xlu1 %v636_v11 }
 0x10a   : > { %232 = vperm.xlu1 %540, %v201_v2  }
 0x10e   : > { %541 = vset.pattern.permute.xlu1 %v637_v12 }
 0x10f   : > { %243 = vperm.xlu1 %541, %v201_v2   ;;  %v318_v37 = vpop.permute.xlu1 %317 }
 0x110   : > { %v324_v41 = vadd.f32 %v323_v36, %v318_v37 }
 0x112   : > { %v325_v44 = vsub.f32 %v324_v41, %v282_v40 }
 0x113   : > { %v285_v23 = vpop.permute.xlu0 %284 }
 0x114   : > { %v291_v31 = vmin.f32 %v285_v23, %v290_v25 }
 0x116   : > { %v301_v38 = vsub.f32 %v291_v31, %v300_v30 }
 0x117   : > { %v328_v33 = vpop.permute.xlu0 %327 }
 0x118   : > { %v334_v39 = vadd.f32 %v333_v32, %v328_v33  ;;  %v303_v48 = vmax.f32 %v301_v38, 0.0 }
 0x11a   : > { %v335_v43 = vsub.f32 %v334_v39, %v301_v38  ;;  %v304_v53 = vmul.f32 %v303_v48, %v302_v47 }
 0x11c   : > { %v336_v46 = vmul.f32 %v335_v43, %v325_v44  ;;  %v223_v60 = vpop.permute.xlu0 %222 }
 0x11d   : > { %v229_v63 = vsub.f32 %v223_v60, %v228_v57 }
 0x11e   : > { %544 = vrcp.f32 %v336_v46 }
 0x11f   : > { %v230_v6 = vand.u32 2147483647, %v229_v63 }
 0x121   : > { %v255_v8 = vpop.permute.xlu0 %254 }
 0x122   : > { %v261_v10 = vsub.f32 %v255_v8, %v260_v3 }
 0x124   : > { %v262_v16 = vand.u32 2147483647, %v261_v10 }
 0x128   : > { %v545_v1 = vpop.eup %544 }
 0x129   : > { %v342_v4 = vmul.f32 %v545_v1, %v336_v46 }
 0x12b   : > { %v343_v11 = vsub.f32 2.0, %v342_v4 }
 0x12d   : > { %v344_v20 = vmul.f32 %v545_v1, %v343_v11 }
 0x184   : > { %v308_v50 = vpop.permute.xlu1 %307 }
 0x185   : > { %v314_v54 = vadd.f32 %v313_v49, %v308_v50 }
 0x187   : > { %v315_v55 = vsub.f32 %v314_v54, %v304_v53 }
 0x189   : > { %546 = vrcp.f32 %v315_v55  ;;  %v233_v59 = vpop.permute.xlu1 %232  ;;  %v345_v17 = vsub.f32 %v336_v46, %v315_v55 }
 0x18a   : > { %v239_v62 = vsub.f32 %v233_v59, %v238_v56 }
 0x18b   : > { %v346_v22 = vmul.f32 %v345_v17, %v344_v20 }
 0x18c   : > { %v240_v5 = vand.u32 2147483647, %v239_v62 }
 0x18e   : > { %v244_v2 = vpop.permute.xlu1 %243  ;;  %v241_v13 = vadd.f32 %v240_v5, %v230_v6 }
 0x18f   : > { %v250_v7 = vsub.f32 %v244_v2, %v249_v0 }
 0x191   : > { %v251_v14 = vand.u32 2147483647, %v250_v7 }
 0x193   : > { %v547_v9 = vpop.eup %546  ;;  %v252_v19 = vadd.f32 %v251_v14, %v241_v13 }
 0x194   : > { %v338_v12 = vmul.f32 %v547_v9, %v315_v55 }
 0x195   : > { %v263_v24 = vadd.f32 %v262_v16, %v252_v19 }
 0x196   : > { %v339_v15 = vsub.f32 2.0, %v338_v12 }
 0x198   : > { %v340_v18 = vmul.f32 %v547_v9, %v339_v15 }
 0x19a   : > { %v347_v21 = vmul.f32 %v340_v18, %v304_v53 }
 0x19c   : > { %v348_v23 = vsub.f32 %v346_v22, %v347_v21 }
 0x19e   : > { %v349_v25 = vadd.f32 %v348_v23, %v263_v24 }
 0x1a0   : > { %350 = vst [vmem:[%s186_s8] sm:$0xff] %v349_v25 }
 0x1a1   : > { %561 = shalt.err (!%p558_p5)
}
 0x1a2   : > { %s562_s27 = scalar_lea.hbm %s729_s20, 128  ;;  %s566_s30 = scalar_lea.hbm %s778_s2, 256 }
 0x1a3   : > { %p563_p6 = scmp.ne.s32.totalorder %s729_s20, %s562_s27  ;;  %p567_p10 = scmp.lt.u32.totalorder %s729_s20, %s778_s2 }
 0x1a4   : > { %p568_p11 = scmp.lt.u32.totalorder %s566_s30, %s562_s27  ;;  %p570_p13 = scmp.lt.u32.totalorder %s562_s27, %s729_s20 }
 0x1a5   : > { %p564_p7 = pnand %p563_p6, %p694_p4 }
 0x1a6   : > { %p569_p12 = por %p568_p11, %p567_p10 }
 0x1a7   : > { %p565_p9 = pneg %p564_p7 }
 0x1a8   : > { %p571_p0 = por %p570_p13, %p569_p12 }
 0x1aa   : > { %p572_p1 = pnand %p571_p0, %p565_p9 }
 0x1ac   : > { %575 = shalt.err (!%p572_p1)
}
 0x1ad   : > { %469 = dma.vmem_to_hbm [thread:$0]  (%p694_p4), %s731_s15, 128, %s729_s20, %s352_s23  }
 0x1ae PF: > { %p475_p2 = scmp.ge.s32.totalorder %s626_s14, 2  ;;  %s379_s5 = sand.u32 1, %s606_s9  }
 0x1af   : > { %s380_s6 = scalar_lea.sflag [#allocation3], %s379_s5 }
 0x1b0   : > { %p472_p3 = pnand %p475_p2, %p701_p8 }
 0x1b2   : > { %601 = dma.done.wait (!%p472_p3), %s380_s6, 128  }
 0x1b3   : > { %603 = vsyncadd (!%p472_p3), %s380_s6, 4294967168  ;;  %s15_s14 = sadd.s32 1, %s626_s14   ;;  %s781_s9 = smov %s610_s10 }
 0x1b4   : > { %p12_p5 = scmp.ge.s32.totalorder %s15_s14, 4   ;;  %s782_s10 = smov %s614_s11 }
 0x1b5   : > { %s783_s11 = smov %s707_s22  ;;  %s784_s12 = smov %s622_s13 }
 0x1b6   : > { %s785_s13 = smov %s787_s17  ;;  %14 = sbr.rel (!%p12_p5) target bundleno = 4 (0x4), region = 66 }
 0x1bd   :  { %385 = vsyncpa [#allocation3], 1 }
 0x1be   :  { %387 = vsyncpa [#allocation3 + $0x1], 1 }

</bundles_post_ra>
